<compile_context>
chip_gen: v7x
topology: tpu7x:2x2x1
jax: 0.10.0
libtpu: 0.0.40
codegen_flags: <defaults>
</compile_context>

<pallas_src>
import jax
import jax.numpy as jnp
from jax.experimental import pallas as pl
from jax.experimental.pallas import tpu as pltpu


def _sq_diff_partial_kernel(x_ref, t_ref, o_ref):
    # o_ref: (8, LANE) f32 partial-sum slab, resident across the inner
    # ("arbitrary") grid axis for the current parallel partition.
    @pl.when(pl.program_id(1) == 0)
    def _():
        o_ref[...] = jnp.zeros_like(o_ref)

    d = x_ref[...].astype(jnp.float32) - t_ref[...].astype(jnp.float32)
    sq = d * d  # (row_tile, LANE)
    # Fold row-groups of 8 sublanes onto each other: aligned whole-vreg adds
    # on the VPU, no cross-lane/XLU work per tile.
    o_ref[...] += sq.reshape(-1, 8, sq.shape[-1]).sum(axis=0)


def _round_up(x, m):
    return ((x + m - 1) // m) * m


def content_loss(x, target, *, lane=512, row_tile_cap=1024, num_partitions=2):
    """x, target: (b, c, h, w) arrays (any float dtype). Returns scalar f32 loss."""
    b, c, h, w = x.shape
    assert target.shape == x.shape
    n = b * c * h * w

    # Lane-dense slab geometry.
    rows_needed = -(-n // lane)  # cdiv
    row_tile = min(
        row_tile_cap,
        _round_up(max(-(-rows_needed // num_partitions), 1), 8),
    )
    rows_padded = _round_up(rows_needed, num_partitions * row_tile)
    padded_n = rows_padded * lane
    inner_steps = rows_padded // (num_partitions * row_tile)

    xf = x.reshape(-1)
    tf = target.reshape(-1)
    if padded_n != n:
        xf = jnp.pad(xf, (0, padded_n - n))
        tf = jnp.pad(tf, (0, padded_n - n))
    x2 = xf.reshape(rows_padded, lane)
    t2 = tf.reshape(rows_padded, lane)

    in_block = pl.BlockSpec(
        (row_tile, lane), lambda p, i: (p * inner_steps + i, 0)
    )

    partials = pl.pallas_call(
        _sq_diff_partial_kernel,
        out_shape=jax.ShapeDtypeStruct((num_partitions, 8, lane), jnp.float32),
        grid_spec=pltpu.PrefetchScalarGridSpec(
            num_scalar_prefetch=0,
            grid=(num_partitions, inner_steps),
            in_specs=[in_block, in_block],
            # One (8, LANE) partial slab per parallel partition; the leading
            # dim is squeezed out of the kernel Ref.
            out_specs=pl.BlockSpec((None, 8, lane), lambda p, i: (p, 0, 0)),
        ),
        compiler_params=pltpu.CompilerParams(
            dimension_semantics=("parallel", "arbitrary"),
            vmem_limit_bytes=48 << 20,  # headroom for 2 MiB double-buffered inputs
        ),
    )(x2, t2)

    # Final cross-lane/partition reduction + normalization: scalar glue in JAX.
    sq_sum = jnp.sum(partials)
    # NOTE: normalizer is c*h*w to match the PyTorch module exactly (it does
    # not divide by the batch size).
    return (sq_sum / jnp.float32(c * h * w)).astype(jnp.float32)


def _reference(x, target):
    b, c, h, w = x.shape
    return (1.0 / (c * h * w)) * jnp.sum(
        (x.astype(jnp.float32) - target.astype(jnp.float32)) ** 2
    )


if __name__ == "__main__":
    key = jax.random.PRNGKey(0)

    # Primary test: the module's implied shape.
    kx, kt = jax.random.split(key)
    b, c, h, w = 2, 4, 16, 16
    x = jax.random.normal(kx, (b, c, h, w), dtype=jnp.float32)
    target = jax.random.normal(kt, (b, c, h, w), dtype=jnp.float32)

    loss = content_loss(x, target)
    jax.block_until_ready(loss)
    ref = _reference(x, target)
    assert jnp.allclose(loss, ref, rtol=1e-5, atol=1e-5), (loss, ref)

    # Secondary test: non-divisible element count exercises the zero-padded tail.
    kx2, kt2 = jax.random.split(jax.random.PRNGKey(1))
    x2 = jax.random.normal(kx2, (2, 3, 17, 19), dtype=jnp.float32)
    t2 = jax.random.normal(kt2, (2, 3, 17, 19), dtype=jnp.float32)
    loss2 = content_loss(x2, t2)
    jax.block_until_ready(loss2)
    ref2 = _reference(x2, t2)
    assert jnp.allclose(loss2, ref2, rtol=1e-5, atol=1e-5), (loss2, ref2)

    print("KERNEL_OK")
</pallas_src>

<mosaic_0001>
module attributes {stable_mosaic.version = 11 : i64} {
  func.func @_sq_diff_partial_kernel(%arg0: i32, %arg1: i32, %arg2: memref<8x512xf32, #tpu.memory_space<vmem>>, %arg3: memref<8x512xf32, #tpu.memory_space<vmem>>, %arg4: memref<1x8x512xf32, #tpu.memory_space<vmem>>) attributes {dimension_semantics = [#tpu.dimension_semantics<parallel>, #tpu.dimension_semantics<arbitrary>], iteration_bounds = array<i64: 2, 1>, scalar_prefetch = 0 : i64, scratch_operands = 0 : i64, tpu.core_type = #tpu.core_type<tc>, window_params = [{transform_indices = @transform_0, window_bounds = array<i64: 8, 512>}, {transform_indices = @transform_1, window_bounds = array<i64: 8, 512>}, {transform_indices = @transform_2, window_bounds = array<i64: 1, 8, 512>}]} {
    %c0_i32 = arith.constant 0 : i32
    %0 = arith.cmpi eq, %arg1, %c0_i32 : i32
    %1 = arith.extui %0 : i1 to i32
    %c0_i32_0 = arith.constant 0 : i32
    %2 = arith.cmpi ne, %1, %c0_i32_0 : i32
    scf.if %2 {
      %cst_10 = arith.constant 0.000000e+00 : f32
      %15 = vector.broadcast %cst_10 : f32 to vector<8x512xf32>
      %c0_11 = arith.constant 0 : index
      %c0_12 = arith.constant 0 : index
      %c0_13 = arith.constant 0 : index
      %16 = vector.load %arg4[%c0_11, %c0_12, %c0_13] : memref<1x8x512xf32, #tpu.memory_space<vmem>>, vector<1x8x512xf32>
      %17 = vector.shape_cast %16 : vector<1x8x512xf32> to vector<8x512xf32>
      %18 = vector.shape_cast %15 : vector<8x512xf32> to vector<1x8x512xf32>
      tpu.vector_store %arg4[%c0_11, %c0_12, %c0_13], %18 {strides = array<i32>} : memref<1x8x512xf32, #tpu.memory_space<vmem>>, vector<1x8x512xf32>,
    } else {
    }
    %c0 = arith.constant 0 : index
    %c0_1 = arith.constant 0 : index
    %3 = vector.load %arg2[%c0, %c0_1] : memref<8x512xf32, #tpu.memory_space<vmem>>, vector<8x512xf32>
    %c0_2 = arith.constant 0 : index
    %c0_3 = arith.constant 0 : index
    %4 = vector.load %arg3[%c0_2, %c0_3] : memref<8x512xf32, #tpu.memory_space<vmem>>, vector<8x512xf32>
    %5 = arith.subf %3, %4 : vector<8x512xf32>
    %6 = arith.mulf %5, %5 : vector<8x512xf32>
    %c0_4 = arith.constant 0 : index
    %c0_5 = arith.constant 0 : index
    %c0_6 = arith.constant 0 : index
    %7 = vector.load %arg4[%c0_4, %c0_5, %c0_6] : memref<1x8x512xf32, #tpu.memory_space<vmem>>, vector<1x8x512xf32>
    %8 = vector.shape_cast %7 : vector<1x8x512xf32> to vector<8x512xf32>
    %9 = vector.shape_cast %6 : vector<8x512xf32> to vector<1x8x512xf32>
    %cst = arith.constant dense<0.000000e+00> : vector<8x512xf32>
    %10 = vector.multi_reduction <add>, %9, %cst [0] : vector<1x8x512xf32> to vector<8x512xf32>
    %11 = arith.addf %8, %10 : vector<8x512xf32>
    %c0_7 = arith.constant 0 : index
    %c0_8 = arith.constant 0 : index
    %c0_9 = arith.constant 0 : index
    %12 = vector.load %arg4[%c0_7, %c0_8, %c0_9] : memref<1x8x512xf32, #tpu.memory_space<vmem>>, vector<1x8x512xf32>
    %13 = vector.shape_cast %12 : vector<1x8x512xf32> to vector<8x512xf32>
    %14 = vector.shape_cast %11 : vector<8x512xf32> to vector<1x8x512xf32>
    tpu.vector_store %arg4[%c0_7, %c0_8, %c0_9], %14 {strides = array<i32>} : memref<1x8x512xf32, #tpu.memory_space<vmem>>, vector<1x8x512xf32>,
    return
  }
  func.func @transform_0(%arg0: i32, %arg1: i32) -> (i32, i32) {
    %c1_i32 = arith.constant 1 : i32
    %0 = arith.muli %arg0, %c1_i32 : i32
    %1 = arith.addi %0, %arg1 : i32
    %c0_i32 = arith.constant 0 : i32
    %c0_i32_0 = arith.constant 0 : i32
    return %1, %c0_i32 : i32, i32
  }
  func.func @transform_1(%arg0: i32, %arg1: i32) -> (i32, i32) {
    %c1_i32 = arith.constant 1 : i32
    %0 = arith.muli %arg0, %c1_i32 : i32
    %1 = arith.addi %0, %arg1 : i32
    %c0_i32 = arith.constant 0 : i32
    %c0_i32_0 = arith.constant 0 : i32
    return %1, %c0_i32 : i32, i32
  }
  func.func @transform_2(%arg0: i32, %arg1: i32) -> (i32, i32, i32) {
    %c0_i32 = arith.constant 0 : i32
    %c0_i32_0 = arith.constant 0 : i32
    %c0_i32_1 = arith.constant 0 : i32
    return %arg0, %c0_i32, %c0_i32_0 : i32, i32, i32
  }
}

</mosaic_0001>

<bundles_post_ra>
// kernel: tpu_custom_call.1
= control target key start
LH: loop header
LB: loop body
LE: loop exit
PB: predicated region body
PF: predicated region fallthrough
CT: control target
= control target key end

     0   :  { %7 = vsyncpa [#allocation3], 0  ;;  %s852_s0 = inlined_call_operand.hbm [shape: f32[16,512], index: 0, kind: input, shape index: {}]   ;;  %s853_s1 = inlined_call_operand.hbm [shape: f32[16,512], index: 1, kind: input, shape index: {}]   ;;  %s854_s2 = inlined_call_operand.hbm [shape: f32[2,8,512], index: 2, kind: output, shape index: {}]  }
   0x1   :  { %9 = vsyncpa [#allocation3 + $0x1], 0 }
   0x2   :  { %10 = vsyncpa [#allocation6], 0 }
   0x3   :  { %12 = vsyncpa [#allocation6 + $0x1], 0 }
   0x4   :  { %13 = vsyncpa [#allocation4], 0 }
   0x5   :  { %15 = vsyncpa [#allocation4 + $0x1], 0  ;;  %s632_s9 = smov 0   ;;  %s634_s10 = smov 0  }
   0x6   :  { %s636_s11 = smov 0   ;;  %s638_s12 = smov 0  }
   0x7   :  { %s640_s13 = smov 0   ;;  %s642_s14 = smov 0  }
   0x8 LB: > { %s376_s15 = sadd.s32 4294967295, %s612_s14   ;;  %s377_s16 = sadd.s32 4294967294, %s612_s14   ;;  %s612_s14 = sphi %s642_s14, %s21_s14   ;;  %s608_s13 = sphi %s640_s13, %s874_s13   ;;  %s604_s12 = sphi %s638_s12, %s873_s12   ;;  %s600_s11 = sphi %s636_s11, %s872_s11   ;;  %s596_s10 = sphi %s634_s10, %s871_s10   ;;  %s592_s9 = sphi %s632_s9, %s870_s9  }
   0x9   : > { %s33_s17 = sadd.s32 1, %s608_s13  ;;  %s42_s18 = sadd.s32 1, %s600_s11 }
   0xa   : > { %p35_p0 = scmp.ge.s32.totalorder %s33_s17, 2  ;;  %p49_p1 = scmp.ne.s32.totalorder %s600_s11, %s596_s10 }
   0xb   : > { %p50_p2 = scmp.eq.s32.totalorder %s612_s14, 0  ;;  %p55_p3 = scmp.ne.s32.totalorder %s596_s10, %s592_s9 }
   0xc   : > { %s876_s17 = smov (%p35_p0, %s33_s17), 0  ;;  %p56_p5 = scmp.eq.s32.totalorder %s376_s15, 0 }
   0xd   : > { %p673_p4 = por %p50_p2, %p49_p1  ;;  %s39_s20 = ssub.s32 %s608_s13, %s876_s17 }
   0xe   : > { %p107_p6 = scmp.eq.s32.totalorder %s376_s15, 1  ;;  %p40_p7 = scmp.eq.s32.totalorder %s39_s20, 0 }
   0xf   : > { %p679_p8 = por %p56_p5, %p55_p3  ;;  %p113_p10 = scmp.eq.s32.totalorder %s377_s16, 1 }
  0x10   : > { %p683_p9 = por %p107_p6, %p49_p1  ;;  %p415_p13 = scmp.lt.s32.totalorder %s612_s14, 2 }
  0x11   : > { %s858_s21 = scalar_select %p679_p8, 1, 0 }
  0x12   : > { %s859_s22 = scalar_select %p683_p9, 1, 0 }
  0x13   : > { %s688_s23 = scalar_select %p40_p7, %s600_s11, %s42_s18  }
  0x14   : > { %p690_p11 = por %p113_p10, %p55_p3  ;;  %s697_s25 = sand.u32 1, %s600_s11  }
  0x15   : > { %s380_s26 = sshll.u32 %s697_s25, 5  ;;  %s395_s27 = sshll.u32 %s608_s13, 9 }
  0x16   : > { %s860_s24 = scalar_select %p690_p11, 1, 0 }
  0x17   : > { %s706_s30 = scalar_lea.hbm %s852_s0, %s395_s27  ;;  %s137_s3 = scalar_lea.vmem [#allocation2], %s380_s26 }
  0x18   : > { %s146_s4 = sshll.u32 %s137_s3, 4  ;;  %p714_p0 = pnand %p415_p13, %p673_p4  ;;  %s710_s4 = int_to_ptr.vmem [resolvable:$true] %s146_s4 }
  0x19   : > { %s134_s6 = scalar_lea.sflag [#allocation3], %s697_s25  ;;  %s466_s7 = scalar_lea.hbm %s706_s30, 512 }
  0x1a   : > { %p467_p3 = scmp.ne.s32.totalorder %s706_s30, %s466_s7  ;;  %p468_p5 = pneg %p714_p0 }
  0x1b   : > { %s471_s16 = scalar_lea.hbm %s852_s0, 1024  ;;  %p472_p4 = scmp.lt.u32.totalorder %s706_s30, %s852_s0 }
  0x1c   : > { %p469_p6 = pnand %p468_p5, %p467_p3  ;;  %p473_p10 = scmp.lt.u32.totalorder %s471_s16, %s466_s7 }
  0x1d   : > { %p475_p12 = scmp.lt.u32.totalorder %s466_s7, %s706_s30 }
  0x1e   : > { %p470_p7 = pneg %p469_p6  ;;  %p474_p13 = por %p473_p10, %p472_p4 }
  0x20   : > { %p476_p1 = por %p475_p12, %p474_p13 }
  0x22   : > { %p477_p2 = pnand %p476_p1, %p470_p7 }
  0x24   : > { %480 = shalt.err (!%p477_p2)
}
  0x25   : > { %s481_s20 = scalar_lea.vmem %s710_s4, 512  ;;  %s614_s28 = smov [#allocation2]  }
  0x26   : > { %p482_p3 = scmp.ne.s32.totalorder %s710_s4, %s481_s20  ;;  %s486_s29 = sshll.u32 %s614_s28, 4  ;;  %s487_s29 = int_to_ptr.vmem [resolvable:$false] %s486_s29 }
  0x27   : > { %s488_s3 = scalar_lea.vmem %s487_s29, 1024  ;;  %p489_p9 = scmp.lt.s32.totalorder %s710_s4, %s487_s29 }
  0x28   : > { %p484_p6 = pnand %p482_p3, %p468_p5  ;;  %p490_p4 = scmp.lt.s32.totalorder %s488_s3, %s481_s20 }
  0x2a   : > { %p485_p11 = pneg %p484_p6  ;;  %p491_p10 = por %p490_p4, %p489_p9 }
  0x2c   : > { %p492_p12 = pnand %p491_p10, %p485_p11 }
  0x2e   : > { %495 = shalt.err (!%p492_p12)
}
  0x2f   : > { %407 = dma.hbm_to_vmem [thread:$0]  (!%p714_p0), %s706_s30, 512, %s710_s4, %s134_s6  }
  0x30   : > { %p862_p1 = scmp.lt.s32.totalorder %s612_s14, 3  ;;  %p863_p2 = scmp.ge.s32.totalorder %s612_s14, 1 }
  0x31   : > { %s759_s16 = scalar_lea.hbm %s853_s1, %s395_s27  ;;  %s157_s18 = scalar_lea.vmem [#allocation5], %s380_s26 }
  0x32   : > { %p750_p7 = pnand %p863_p2, %p862_p1  ;;  %s166_s19 = sshll.u32 %s157_s18, 4  ;;  %s167_s19 = int_to_ptr.vmem [resolvable:$true] %s166_s19 }
  0x33   : > { %s154_s30 = scalar_lea.sflag [#allocation6], %s697_s25  ;;  %s496_s4 = scalar_lea.hbm %s759_s16, 512 }
  0x34   : > { %s864_s7 = scalar_select %p750_p7, 1, 0 }
  0x35   : > { %p497_p9 = scmp.ne.s32.totalorder %s759_s16, %s496_s4  ;;  %s501_s27 = scalar_lea.hbm %s853_s1, 1024 }
  0x36   : > { %p502_p3 = scmp.lt.u32.totalorder %s759_s16, %s853_s1  ;;  %p503_p6 = scmp.lt.u32.totalorder %s501_s27, %s496_s4 }
  0x37   : > { %p499_p11 = pnand %p497_p9, %p468_p5  ;;  %p505_p10 = scmp.lt.u32.totalorder %s496_s4, %s759_s16 }
  0x38   : > { %p504_p4 = por %p503_p6, %p502_p3 }
  0x39   : > { %p500_p13 = pneg %p499_p11 }
  0x3a   : > { %p506_p12 = por %p505_p10, %p504_p4 }
  0x3c   : > { %p507_p1 = pnand %p506_p12, %p500_p13 }
  0x3e   : > { %510 = shalt.err (!%p507_p1)
}
  0x3f   : > { %s511_s25 = scalar_lea.vmem %s167_s19, 512  ;;  %s615_s26 = smov [#allocation5]  }
  0x40   : > { %p512_p2 = scmp.ne.s32.totalorder %s167_s19, %s511_s25  ;;  %s516_s3 = sshll.u32 %s615_s26, 4  ;;  %s517_s3 = int_to_ptr.vmem [resolvable:$false] %s516_s3 }
  0x41   : > { %s518_s8 = scalar_lea.vmem %s517_s3, 1024  ;;  %p519_p8 = scmp.lt.s32.totalorder %s167_s19, %s517_s3 }
  0x42   : > { %p514_p9 = pnand %p512_p2, %p468_p5  ;;  %p520_p7 = scmp.lt.s32.totalorder %s518_s8, %s511_s25 }
  0x44   : > { %p515_p11 = pneg %p514_p9  ;;  %p521_p3 = por %p520_p7, %p519_p8 }
  0x46   : > { %p522_p6 = pnand %p521_p3, %p515_p11 }
  0x48   : > { %525 = shalt.err (!%p522_p6)
}
  0x49   : > { %410 = dma.hbm_to_vmem [thread:$0]  (!%p714_p0), %s759_s16, 512, %s167_s19, %s154_s30  }
  0x4a   : > { %p865_p13 = scmp.ne.s32.totalorder %s864_s7, 0 }
  0x4b   : > { %s786_s15 = sand.u32 (!%p865_p13), 1, %s596_s10   ;;  %p866_p5 = scmp.ne.s32.totalorder (!%p865_p13), %s858_s21, 0 }
  0x4c   : > { %175 = sbr.rel (%p865_p13) target bundleno = 112 (0x70), region = 28  ;;  %s387_s18 = sshll.u32 (!%p865_p13), %s786_s15, 5 }
  0x4d   : > { %s178_s4 = scalar_lea.sflag (!%p865_p13), [#allocation3], %s786_s15  ;;  %s181_s6 = scalar_lea.vmem (!%p865_p13), [#allocation2], %s387_s18 }
  0x53   : > { %579 = dma.done.wait (%p866_p5), %s178_s4, 512  }
  0x54   : > { %581 = vsyncadd (%p866_p5), %s178_s4, 4294966784  ;;  %s187_s5 = scalar_lea.sflag [#allocation6], %s786_s15  ;;  %s190_s16 = scalar_lea.vmem [#allocation5], %s387_s18 }
  0x55   : > { %583 = dma.done.wait (%p866_p5), %s187_s5, 512  }
  0x56   : > { %585 = vsyncadd (%p866_p5), %s187_s5, 4294966784  ;;  %v226_v0 = vld [vmem:[%s181_s6] sm:$0xff]  ;;  %v227_v2 = vld [vmem:[%s181_s6 + $0x8] sm:$0xff]  ;;  %s397_s21 = sshll.u32 %s604_s12, 9  ;;  %s215_s7 = scalar_lea.vmem [#allocation7], %s387_s18 }
  0x57   : > { %v230_v1 = vld [vmem:[%s190_s16] sm:$0xff]  ;;  %v231_v4 = vld [vmem:[%s190_s16 + $0x8] sm:$0xff]  ;;  %v228_v5 = vld [vmem:[%s181_s6 + $0x10] sm:$0xff]  ;;  %s273_s19 = sshll.u32 %s215_s7, 4  ;;  %s803_s27 = scalar_lea.hbm %s854_s2, %s397_s21  ;;  %s805_s19 = int_to_ptr.vmem [resolvable:$true] %s273_s19 }
  0x58   : > { %v234_v3 = vsub.f32 %v226_v0, %v230_v1  ;;  %v232_v6 = vld [vmem:[%s190_s16 + $0x10] sm:$0xff]  ;;  %v235_v7 = vsub.f32 %v227_v2, %v231_v4  ;;  %v229_v9 = vld [vmem:[%s181_s6 + $0x18] sm:$0xff]  ;;  %s259_s28 = scalar_lea.sflag [#allocation4], %s786_s15  ;;  %s526_s29 = scalar_lea.vmem %s805_s19, 512 }
  0x59   : > { %v236_v8 = vsub.f32 %v228_v5, %v232_v6  ;;  %v233_v10 = vld [vmem:[%s190_s16 + $0x18] sm:$0xff]  ;;  %p527_p8 = scmp.ne.s32.totalorder %s805_s19, %s526_s29  ;;  %p867_p0 = scmp.ne.s32.totalorder %s859_s22, 0 }
  0x5a   : > { %v238_v11 = vmul.f32 %v234_v3, %v234_v3  ;;  %v237_v12 = vsub.f32 %v229_v9, %v233_v10  ;;  %v239_v13 = vmul.f32 %v235_v7, %v235_v7  ;;  %s616_s12 = smov [#allocation7]  }
  0x5b   : > { %v240_v14 = vmul.f32 %v236_v8, %v236_v8  ;;  %p528_p7 = pnand %p527_p8, %p867_p0  ;;  %s530_s25 = sshll.u32 %s616_s12, 4  ;;  %s531_s25 = int_to_ptr.vmem [resolvable:$false] %s530_s25 }
  0x5c   : > { %v241_v15 = vmul.f32 %v237_v12, %v237_v12  ;;  %254 = vst [vmem:[%s215_s7] sm:$0xff] %v238_v11  ;;  %255 = vst [vmem:[%s215_s7 + $0x8] sm:$0xff] %v239_v13  ;;  %s532_s26 = scalar_lea.vmem %s531_s25, 1024  ;;  %p533_p10 = scmp.lt.s32.totalorder %s805_s19, %s531_s25 }
  0x5d   : > { %256 = vst [vmem:[%s215_s7 + $0x10] sm:$0xff] %v240_v14  ;;  %p529_p4 = pneg %p528_p7  ;;  %p534_p12 = scmp.lt.s32.totalorder %s532_s26, %s526_s29 }
  0x5e   : > { %257 = vst [vmem:[%s215_s7 + $0x18] sm:$0xff] %v241_v15 }
  0x5f   : > { %p535_p1 = por %p534_p12, %p533_p10 }
  0x61   : > { %p536_p2 = pnand %p535_p1, %p529_p4 }
  0x63   : > { %539 = shalt.err (!%p536_p2)
}
  0x64   : > { %s540_s3 = scalar_lea.hbm %s803_s27, 512  ;;  %s544_s18 = scalar_lea.hbm %s854_s2, 1024 }
  0x65   : > { %p541_p9 = scmp.ne.s32.totalorder %s803_s27, %s540_s3  ;;  %p545_p6 = scmp.lt.u32.totalorder %s803_s27, %s854_s2 }
  0x66   : > { %p546_p13 = scmp.lt.u32.totalorder %s544_s18, %s540_s3  ;;  %p548_p8 = scmp.lt.u32.totalorder %s540_s3, %s803_s27 }
  0x67   : > { %p542_p11 = pnand %p541_p9, %p867_p0 }
  0x68   : > { %p547_p5 = por %p546_p13, %p545_p6 }
  0x69   : > { %p543_p3 = pneg %p542_p11 }
  0x6a   : > { %p549_p7 = por %p548_p8, %p547_p5 }
  0x6c   : > { %p550_p4 = pnand %p549_p7, %p543_p3 }
  0x6e   : > { %553 = shalt.err (!%p550_p4)
}
  0x6f   : > { %402 = dma.vmem_to_hbm [thread:$0]  (%p867_p0), %s805_s19, 512, %s803_s27, %s259_s28  }
  0x70 PF: > { %s285_s5 = sand.u32 1, %s592_s9   ;;  %p868_p10 = scmp.ne.s32.totalorder %s860_s24, 0 }
  0x71   : > { %p869_p12 = scmp.ge.s32.totalorder %s612_s14, 2  ;;  %s286_s16 = scalar_lea.sflag [#allocation4], %s285_s5 }
  0x73   : > { %p412_p1 = pnand %p869_p12, %p868_p10 }
  0x75   : > { %587 = dma.done.wait (!%p412_p1), %s286_s16, 512  }
  0x76   : > { %589 = vsyncadd (!%p412_p1), %s286_s16, 4294966784  ;;  %s21_s14 = sadd.s32 1, %s612_s14   ;;  %s870_s9 = smov %s596_s10 }
  0x77   : > { %p18_p2 = scmp.ge.s32.totalorder %s21_s14, 4   ;;  %s871_s10 = smov %s600_s11 }
  0x78   : > { %s872_s11 = smov %s688_s23  ;;  %s873_s12 = smov %s608_s13 }
  0x79   : > { %s874_s13 = smov %s876_s17  ;;  %20 = sbr.rel (!%p18_p2) target bundleno = 8 (0x8), region = 90 }
  0x80   :  { %291 = vsyncpa [#allocation3], 1 }
  0x81   :  { %293 = vsyncpa [#allocation3 + $0x1], 1 }
  0x82   :  { %294 = vsyncpa [#allocation6], 1 }
  0x83   :  { %296 = vsyncpa [#allocation6 + $0x1], 1 }
  0x84   :  { %297 = vsyncpa [#allocation4], 1 }
  0x85   :  { %299 = vsyncpa [#allocation4 + $0x1], 1 }

</bundles_post_ra>
